<compile_context>
chip_gen: v7x
topology: tpu7x:2x2x1
jax: 0.10.0
libtpu: 0.0.40
codegen_flags: <defaults>
</compile_context>

<pallas_src>
import jax
import jax.numpy as jnp
from jax.experimental import pallas as pl
from jax.experimental.pallas import tpu as pltpu

BN_EPS = 1e-5


def convblock_kernel(patches_ref, w_ref, out_ref):
    """Fused conv3x3 (+folded BN, +bias) -> ReLU -> 2x2/2 max-pool.

    patches_ref: (K+1, 4*G)  im2col patches with a constant-1 row appended; columns
                 are ordered [pool position p major, output pixel g minor], p = di*2+dj.
    w_ref:       (Cout, K+1) BN-folded conv weights; last column is the folded bias.
    out_ref:     (Cout, G)   pooled output, g = ((n*Ho)+i)*Wo + j.
    """
    G = out_ref.shape[1]
    # One MXU push for the whole layer (conv + bias via the affine column).
    y = jnp.dot(w_ref[...], patches_ref[...],
                preferred_element_type=jnp.float32)          # (Cout, 4*G)
    y = jnp.maximum(y, 0.0)                                  # ReLU
    # 2x2 max-pool: the 4 window positions are 4 lane-aligned column groups.
    pooled = jnp.maximum(jnp.maximum(y[:, 0 * G:1 * G], y[:, 1 * G:2 * G]),
                         jnp.maximum(y[:, 2 * G:3 * G], y[:, 3 * G:4 * G]))
    out_ref[...] = pooled.astype(out_ref.dtype)


def prepare_params(conv_w, conv_b, gamma, beta, running_mean, running_var, eps=BN_EPS):
    """One-time prep: fold inference-mode BN into the conv and pack to (Cout, 9*Cin+1)."""
    conv_w = conv_w.astype(jnp.float32)
    conv_b = conv_b.astype(jnp.float32)
    scale = gamma.astype(jnp.float32) / jnp.sqrt(running_var.astype(jnp.float32) + eps)
    w_f = conv_w * scale[:, None, None, None]                          # (Cout,Cin,3,3)
    b_f = (conv_b - running_mean.astype(jnp.float32)) * scale + beta.astype(jnp.float32)
    cout, cin = conv_w.shape[0], conv_w.shape[1]
    # Patch feature ordering is (dy, dx, ci)  ->  k = (dy*3 + dx)*Cin + ci.
    w_mat = jnp.transpose(w_f, (2, 3, 1, 0)).reshape(9 * cin, cout)    # (K, Cout)
    return jnp.concatenate([w_mat.T, b_f[:, None]], axis=1)            # (Cout, K+1)


@jax.jit
def convblock_forward(w_aug, x):
    """x: (N, Cin, H, W) NCHW  ->  (N, Cout, H//2, W//2) NCHW."""
    N, Cin, H, W = x.shape
    Cout, K1 = w_aug.shape
    K = K1 - 1
    Ho, Wo = H // 2, W // 2
    G = N * Ho * Wo

    # ---- im2col (pure data movement, done by XLA in the wrapper) ----
    xt = jnp.transpose(x, (0, 2, 3, 1)).astype(jnp.float32)            # NHWC
    xp = jnp.pad(xt, ((0, 0), (1, 1), (1, 1), (0, 0)))                 # zero pad=1
    pats = [xp[:, dy:dy + H, dx:dx + W, :] for dy in range(3) for dx in range(3)]
    pf = jnp.concatenate(pats, axis=-1)                                # (N,H,W,K)
    # Group the 4 pixels of each 2x2 pooling window as the leading column index.
    pf = pf.reshape(N, Ho, 2, Wo, 2, K)                                # (n,i,di,j,dj,k)
    pf = pf.transpose(5, 2, 4, 0, 1, 3)                                # (k,di,dj,n,i,j)
    pf = pf.reshape(K, 4 * G)                                          # col = p*G + g
    patches = jnp.concatenate([pf, jnp.ones((1, 4 * G), jnp.float32)], axis=0)  # (K+1,4G)

    out = pl.pallas_call(
        convblock_kernel,
        out_shape=jax.ShapeDtypeStruct((Cout, G), jnp.float32),
        grid_spec=pltpu.PrefetchScalarGridSpec(
            num_scalar_prefetch=0,
            grid=(),
            in_specs=[pl.BlockSpec((K1, 4 * G), lambda: (0, 0)),
                      pl.BlockSpec((Cout, K1), lambda: (0, 0))],
            out_specs=pl.BlockSpec((Cout, G), lambda: (0, 0)),
        ),
        cost_estimate=pl.CostEstimate(
            flops=2 * Cout * K1 * 4 * G,
            transcendentals=0,
            bytes_accessed=4 * (K1 * 4 * G + Cout * K1 + Cout * G),
        ),
    )(patches, w_aug)

    return out.reshape(Cout, N, Ho, Wo).transpose(1, 0, 2, 3)          # NCHW


def reference_forward(conv_w, conv_b, gamma, beta, running_mean, running_var, x,
                      eps=BN_EPS):
    """Pure-JAX reference: conv -> BN(eval) -> ReLU -> maxpool."""
    y = jax.lax.conv_general_dilated(
        x.astype(jnp.float32), conv_w.astype(jnp.float32),
        window_strides=(1, 1), padding=((1, 1), (1, 1)),
        dimension_numbers=("NCHW", "OIHW", "NCHW"))
    y = y + conv_b[None, :, None, None]
    y = (y - running_mean[None, :, None, None]) / jnp.sqrt(
        running_var[None, :, None, None] + eps)
    y = y * gamma[None, :, None, None] + beta[None, :, None, None]
    y = jnp.maximum(y, 0.0)
    y = jax.lax.reduce_window(y, -jnp.inf, jax.lax.max,
                              window_dimensions=(1, 1, 2, 2),
                              window_strides=(1, 1, 2, 2),
                              padding="VALID")
    return y


if __name__ == "__main__":
    key = jax.random.PRNGKey(0)
    kx, kw, kb, kg, kbe, km, kv = jax.random.split(key, 7)

    N, CIN, COUT, H, W = 2, 4, 8, 16, 16
    x = jax.random.normal(kx, (N, CIN, H, W), jnp.float32)

    # Conv2d default-ish init + non-trivial BatchNorm parameters / running stats.
    fan_in = CIN * 3 * 3
    bound = 1.0 / float(fan_in) ** 0.5
    conv_w = jax.random.uniform(kw, (COUT, CIN, 3, 3), jnp.float32, -bound, bound)
    conv_b = jax.random.uniform(kb, (COUT,), jnp.float32, -bound, bound)
    gamma = jax.random.uniform(kg, (COUT,), jnp.float32, 0.5, 1.5)
    beta = 0.1 * jax.random.normal(kbe, (COUT,), jnp.float32)
    running_mean = 0.1 * jax.random.normal(km, (COUT,), jnp.float32)
    running_var = jax.random.uniform(kv, (COUT,), jnp.float32, 0.5, 1.5)

    # One-time parameter preparation (BN fold + packing), outside the per-call path.
    w_aug = prepare_params(conv_w, conv_b, gamma, beta, running_mean, running_var)
    w_aug = jax.block_until_ready(w_aug)

    out = convblock_forward(w_aug, x)
    out = jax.block_until_ready(out)

    ref = reference_forward(conv_w, conv_b, gamma, beta, running_mean, running_var, x)
    ref = jax.block_until_ready(ref)

    assert out.shape == (N, COUT, H // 2, W // 2), out.shape
    assert jnp.allclose(out, ref, atol=1e-4, rtol=1e-4), float(jnp.max(jnp.abs(out - ref)))

    print("KERNEL_OK")
</pallas_src>

<mosaic_0001>
module attributes {stable_mosaic.version = 11 : i64} {
  func.func @convblock_kernel(%arg0: memref<37x512xf32, #tpu.memory_space<vmem>>, %arg1: memref<8x37xf32, #tpu.memory_space<vmem>>, %arg2: memref<8x128xf32, #tpu.memory_space<vmem>>) attributes {dimension_semantics = [], scalar_prefetch = 0 : i64, scratch_operands = 0 : i64, tpu.core_type = #tpu.core_type<tc>} {
    %c0 = arith.constant 0 : index
    %c0_0 = arith.constant 0 : index
    %0 = vector.load %arg1[%c0, %c0_0] : memref<8x37xf32, #tpu.memory_space<vmem>>, vector<8x37xf32>
    %c0_1 = arith.constant 0 : index
    %c0_2 = arith.constant 0 : index
    %1 = vector.load %arg0[%c0_1, %c0_2] : memref<37x512xf32, #tpu.memory_space<vmem>>, vector<37x512xf32>
    %cst = arith.constant dense<0.000000e+00> : vector<8x512xf32>
    %2 = tpu.matmul %0, %1, %cst {dimension_numbers = #tpu.dot_dimension_numbers<[1], [0], [0], [1], [0, 0, 1, 1], [], []>} : vector<8x37xf32>, vector<37x512xf32>, vector<8x512xf32> -> vector<8x512xf32>
    %cst_3 = arith.constant 0.000000e+00 : f32
    %3 = vector.broadcast %cst_3 : f32 to vector<8x512xf32>
    %4 = arith.maximumf %2, %3 : vector<8x512xf32>
    %5 = vector.extract_strided_slice %4 {offsets = [0, 0], sizes = [8, 128], strides = [1, 1]} : vector<8x512xf32> to vector<8x128xf32>
    %6 = vector.extract_strided_slice %4 {offsets = [0, 128], sizes = [8, 128], strides = [1, 1]} : vector<8x512xf32> to vector<8x128xf32>
    %7 = arith.maximumf %5, %6 : vector<8x128xf32>
    %8 = vector.extract_strided_slice %4 {offsets = [0, 256], sizes = [8, 128], strides = [1, 1]} : vector<8x512xf32> to vector<8x128xf32>
    %9 = vector.extract_strided_slice %4 {offsets = [0, 384], sizes = [8, 128], strides = [1, 1]} : vector<8x512xf32> to vector<8x128xf32>
    %10 = arith.maximumf %8, %9 : vector<8x128xf32>
    %11 = arith.maximumf %7, %10 : vector<8x128xf32>
    %c0_4 = arith.constant 0 : index
    %c0_5 = arith.constant 0 : index
    %12 = vector.load %arg2[%c0_4, %c0_5] : memref<8x128xf32, #tpu.memory_space<vmem>>, vector<8x128xf32>
    tpu.vector_store %arg2[%c0_4, %c0_5], %11 {strides = array<i32>} : memref<8x128xf32, #tpu.memory_space<vmem>>, vector<8x128xf32>,
    return
  }
}

</mosaic_0001>

<bundles_post_ra>
// kernel: convblock_forward.1
= control target key start
LH: loop header
LB: loop body
LE: loop exit
PB: predicated region body
PF: predicated region fallthrough
CT: control target
= control target key end

     0   :  { %v226_v3 = vmov 0.0   ;;  %vm36_vm0 = vcmask 1044480   ;;  %vm32_vm1 = vcmask 302080   ;;  %s308_s0 = inlined_call_operand.vmem [shape: f32[37,512], index: 0, kind: input, shape index: {}]   ;;  %s309_s1 = inlined_call_operand.vmem [shape: f32[8,37], index: 1, kind: input, shape index: {}]   ;;  %s310_s2 = inlined_call_operand.vmem [shape: f32[8,128], index: 2, kind: output, shape index: {}]  }
   0x1   :  { %v13_v0 = vld [vmem:[%s308_s0 + $0x8] sm:$0xff]  ;;  %v15_v2 = vld [vmem:[%s308_s0 + $0x18] sm:$0xff]  ;;  %113 = vmatprep.mubr.f32.mxu0 %v226_v3  ;;  %184 = vmatprep.mubr.f32.mxu1 %v226_v3  ;;  %v12_v6 = vld [vmem:[%s308_s0] sm:$0xff] }
   0x2   :  { %v17_v1 = vld [vmem:[%s308_s0 + $0x28] sm:$0xff]  ;;  %v19_v5 = vld [vmem:[%s308_s0 + $0x38] sm:$0xff]  ;;  %v16_v7 = vld [vmem:[%s308_s0 + $0x20] sm:$0xff] }
   0x3   :  { %v209_v4 = vpack.c.bf16 %v17_v1, %v13_v0  ;;  %v217_v8 = vpack.c.bf16 %v19_v5, %v15_v2  ;;  %v211_v9 = vpack.c.bf16 %v16_v7, %v12_v6  ;;  %v14_v10 = vld [vmem:[%s308_s0 + $0x10] sm:$0xff]  ;;  %v21_v12 = vld [vmem:[%s308_s0 + $0x48] sm:$0xff]  ;;  %v23_v15 = vld [vmem:[%s308_s0 + $0x58] sm:$0xff] }
   0x4   :  { %v18_v11 = vld [vmem:[%s308_s0 + $0x30] sm:$0xff]  ;;  %v25_v14 = vld [vmem:[%s308_s0 + $0x68] sm:$0xff]  ;;  %v27_v16 = vld [vmem:[%s308_s0 + $0x78] sm:$0xff] }
   0x5   :  { %210 = vmatprep.subr.bf16.mxu0 %v209_v4  ;;  %v219_v13 = vpack.c.bf16 %v18_v11, %v14_v10  ;;  %218 = vmatprep.subr.bf16.mxu1 %v217_v8  ;;  %v213_v17 = vpack.c.bf16 %v25_v14, %v21_v12  ;;  %v221_v18 = vpack.c.bf16 %v27_v16, %v23_v15  ;;  %v20_v19 = vld [vmem:[%s308_s0 + $0x40] sm:$0xff]  ;;  %v22_v21 = vld [vmem:[%s308_s0 + $0x50] sm:$0xff]  ;;  %v29_v25 = vld [vmem:[%s308_s0 + $0x88] sm:$0x1f] }
   0x6   :  { %212 = vmatpush1.bf16.msra.mxu0 %v211_v9  ;;  %v24_v20 = vld [vmem:[%s308_s0 + $0x60] sm:$0xff]  ;;  %v26_v23 = vld [vmem:[%s308_s0 + $0x70] sm:$0xff]  ;;  %v31_v26 = vld [vmem:[%s308_s0 + $0x98] sm:$0x1f] }
   0x7   :  { %220 = vmatpush1.bf16.msra.mxu1 %v219_v13  ;;  %v215_v22 = vpack.c.bf16 %v24_v20, %v20_v19  ;;  %214 = vmatprep.subr.bf16.mxu0 %v213_v17  ;;  %v223_v24 = vpack.c.bf16 %v26_v23, %v22_v21  ;;  %v28_v27 = vld [vmem:[%s308_s0 + $0x80] sm:$0x1f]  ;;  %v30_v28 = vld [vmem:[%s308_s0 + $0x90] sm:$0x1f] }
   0x8   :  { %222 = vmatprep.subr.bf16.mxu1 %v221_v18  ;;  %v11_v29 = vld [vmem:[%s309_s1] sm:$0xff] }
   0xa   :  { %216 = vmatpush1.bf16.msra.mxu0 %v215_v22 }
   0xb   :  { %224 = vmatpush1.bf16.msra.mxu1 %v223_v24  ;;  %203 = vmatprep.subr.msk.mxu0 %vm36_vm0, %v29_v25 }
   0xc   :  { %206 = vmatprep.subr.msk.mxu1 %vm36_vm0, %v31_v26 }
   0xe   :  { %204 = vmatpush1.msk.msra.mxu0 %vm36_vm0, %v28_v27 }
   0xf   :  { %207 = vmatpush1.msk.msra.mxu1 %vm36_vm0, %v30_v28  ;;  %205 = vmatmul.mubr.msk.f32.vlgmr.msra.gmra.mrb[0].mxu0 %vm32_vm1, %v11_v29 }
  0x10   :  { %208 = vmatmul.mubr.msk.f32.vlgmr.msra.gmra.mrb[0].mxu1 %vm32_vm1, %v11_v29 }
  0xe2   :  { %v115_v30 = vpop.f32.mrb[0].mxu0 }
  0xe3   :  { %v191_v31 = vmax.f32 %v115_v30, 0.0  ;;  %v186_v32 = vpop.f32.mrb[0].mxu1  ;;  %v117_v33 = vpop.f32.mrb[1].mxu0 }
  0xe4   :  { %v193_v34 = vmax.f32 %v186_v32, 0.0  ;;  %v192_v35 = vmax.f32 %v117_v33, 0.0  ;;  %v188_v36 = vpop.f32.mrb[1].mxu1 }
  0xe5   :  { %v194_v37 = vmax.f32 %v188_v36, 0.0 }
  0xe6   :  { %v195_v38 = vmax.f32 %v191_v31, %v192_v35 }
  0xe7   :  { %v196_v39 = vmax.f32 %v193_v34, %v194_v37 }
  0xe9   :  { %v197_v40 = vmax.f32 %v195_v38, %v196_v39 }
  0xeb   :  { %198 = vst [vmem:[%s310_s2] sm:$0xff] %v197_v40 }

</bundles_post_ra>
